<compile_context>
chip_gen: v7x
topology: tpu7x:2x2x1
jax: 0.10.0
libtpu: 0.0.40
codegen_flags: <defaults>
</compile_context>

<pallas_src>
import functools

import jax
import jax.numpy as jnp
from jax.experimental import pallas as pl
from jax.experimental.pallas import tpu as pltpu

F32 = jnp.float32
BF16 = jnp.bfloat16

_VMEM_LIMIT = 48 * 1024 * 1024  # > v5e 16 MiB scoped default, < v7x 64 MiB physical


def _cparams(*dims):
    return pltpu.CompilerParams(dimension_semantics=dims,
                                vmem_limit_bytes=_VMEM_LIMIT)


def _tile(dim, target, multiple):
    """Largest divisor of `dim` that is <= target and a multiple of `multiple`.

    Small dims are kept whole.  If no aligned divisor exists the full dim is
    returned (callers with potentially huge, prime-ish dims use cdiv grids instead).
    """
    if dim <= target:
        return dim
    t = (target // multiple) * multiple
    while t >= multiple:
        if dim % t == 0:
            return t
        t -= multiple
    return dim


def _gelu(x):
    # tanh-approx GELU (EUP friendly); matches erf-GELU to ~1e-3.
    return 0.5 * x * (1.0 + jnp.tanh(0.7978845608028654 * (x + 0.044715 * x * x * x)))


# ----------------------------- Pallas kernels ------------------------------

def _linear_f32_kernel(x_ref, w_ref, b_ref, o_ref, *, act):
    """bf16 x bf16 matmul, accumulate directly into the resident f32 out block."""
    k = pl.program_id(2)

    @pl.when(k == 0)
    def _():
        o_ref[...] = jnp.zeros_like(o_ref)

    o_ref[...] += jnp.dot(x_ref[...], w_ref[...], preferred_element_type=jnp.float32)

    @pl.when(k == pl.num_programs(2) - 1)
    def _():
        y = o_ref[...] + b_ref[...]
        if act == "gelu":
            y = _gelu(y)
        o_ref[...] = y


def _linear_bf16_kernel(x_ref, w_ref, b_ref, o_ref, acc_ref, *, act):
    """Same as above but with an f32 scratch accumulator (bf16 output)."""
    k = pl.program_id(2)

    @pl.when(k == 0)
    def _():
        acc_ref[...] = jnp.zeros_like(acc_ref)

    acc_ref[...] += jnp.dot(x_ref[...], w_ref[...], preferred_element_type=jnp.float32)

    @pl.when(k == pl.num_programs(2) - 1)
    def _():
        y = acc_ref[...] + b_ref[...]
        if act == "gelu":
            y = _gelu(y)
        o_ref[...] = y.astype(o_ref.dtype)


def linear(x, w, b, act="none", out_dtype=F32, tm=256, tn=512, tk=512):
    """x:(M,K) @ w:(K,N) + b, fed to the MXU in bf16, optional fused GELU."""
    M, K = x.shape
    N = w.shape[1]
    tm = _tile(M, tm, 8)
    tn = _tile(N, tn, 128)
    tk = _tile(K, tk, 128)
    cost = pl.CostEstimate(flops=2 * M * N * K, transcendentals=0,
                           bytes_accessed=2 * M * K + 2 * K * N + 4 * M * N)
    if out_dtype == F32:
        kernel = functools.partial(_linear_f32_kernel, act=act)
        scratch = []
    else:
        kernel = functools.partial(_linear_bf16_kernel, act=act)
        scratch = [pltpu.VMEM((tm, tn), jnp.float32)]
    return pl.pallas_call(
        kernel,
        out_shape=jax.ShapeDtypeStruct((M, N), out_dtype),
        grid=(M // tm, N // tn, K // tk),
        in_specs=[pl.BlockSpec((tm, tk), lambda i, j, k: (i, k)),
                  pl.BlockSpec((tk, tn), lambda i, j, k: (k, j)),
                  pl.BlockSpec((1, tn), lambda i, j, k: (0, j))],
        out_specs=pl.BlockSpec((tm, tn), lambda i, j, k: (i, j)),
        scratch_shapes=scratch,
        compiler_params=_cparams("parallel", "parallel", "arbitrary"),
        cost_estimate=cost,
    )(x.astype(BF16), w.astype(BF16), b.astype(F32).reshape(1, N))


def _linear_add_ln_kernel(x_ref, w_ref, b_ref, r_ref, g_ref, be_ref,
                          o32_ref, o16_ref, *, eps):
    """Linear with residual-add + LayerNorm fused into the K-finalize epilogue.

    Emits an f32 copy (residual stream) and a bf16 copy (next matmul input)."""
    k = pl.program_id(1)

    @pl.when(k == 0)
    def _():
        o32_ref[...] = jnp.zeros_like(o32_ref)

    o32_ref[...] += jnp.dot(x_ref[...], w_ref[...], preferred_element_type=jnp.float32)

    @pl.when(k == pl.num_programs(1) - 1)
    def _():
        y = o32_ref[...] + b_ref[...] + r_ref[...]
        mu = jnp.mean(y, axis=-1, keepdims=True)
        yc = y - mu
        var = jnp.mean(yc * yc, axis=-1, keepdims=True)
        y = yc * jax.lax.rsqrt(var + eps) * g_ref[...] + be_ref[...]
        o32_ref[...] = y
        o16_ref[...] = y.astype(o16_ref.dtype)


def linear_add_ln(x, w, b, residual, gamma, beta, eps=1e-12, tm=256, tk=512):
    """LayerNorm(x @ w + b + residual); N kept as a single block so the full feature
    row is resident at finalize (H=768 real / tiny toy)."""
    M, K = x.shape
    N = w.shape[1]
    tm = _tile(M, tm, 8)
    tk = _tile(K, tk, 128)
    cost = pl.CostEstimate(flops=2 * M * N * K, transcendentals=0,
                           bytes_accessed=2 * M * K + 2 * K * N + 10 * M * N)
    return pl.pallas_call(
        functools.partial(_linear_add_ln_kernel, eps=eps),
        out_shape=(jax.ShapeDtypeStruct((M, N), F32),
                   jax.ShapeDtypeStruct((M, N), BF16)),
        grid=(M // tm, K // tk),
        in_specs=[pl.BlockSpec((tm, tk), lambda i, k: (i, k)),
                  pl.BlockSpec((tk, N), lambda i, k: (k, 0)),
                  pl.BlockSpec((1, N), lambda i, k: (0, 0)),
                  pl.BlockSpec((tm, N), lambda i, k: (i, 0)),
                  pl.BlockSpec((1, N), lambda i, k: (0, 0)),
                  pl.BlockSpec((1, N), lambda i, k: (0, 0))],
        out_specs=(pl.BlockSpec((tm, N), lambda i, k: (i, 0)),
                   pl.BlockSpec((tm, N), lambda i, k: (i, 0))),
        compiler_params=_cparams("parallel", "arbitrary"),
        cost_estimate=cost,
    )(x.astype(BF16), w.astype(BF16), b.astype(F32).reshape(1, N),
      residual, gamma.astype(F32).reshape(1, N), beta.astype(F32).reshape(1, N))


def _head_attention(q, k, v, scale, out_dtype):
    s = jax.lax.dot_general(q, k, (((1,), (1,)), ((), ())),
                            preferred_element_type=jnp.float32) * scale
    s = s - jnp.max(s, axis=-1, keepdims=True)
    p = jnp.exp(s)
    p = p * pl.reciprocal(jnp.sum(p, axis=-1, keepdims=True), approx=True)
    return jnp.dot(p.astype(q.dtype), v,
                   preferred_element_type=jnp.float32).astype(out_dtype)


def _packed_mha_kernel(qkv_ref, o_ref, *, num_heads, scale):
    """Self-attention from a packed [q|k|v] block; per-head result stored directly
    into its output lane slice (no concatenate, bounded vreg live range)."""
    E = o_ref.shape[-1]
    D = E // num_heads
    for h in range(num_heads):
        q = qkv_ref[0, :, h * D:(h + 1) * D]
        k = qkv_ref[0, :, E + h * D:E + (h + 1) * D]
        v = qkv_ref[0, :, 2 * E + h * D:2 * E + (h + 1) * D]
        o_ref[0, :, h * D:(h + 1) * D] = _head_attention(q, k, v, scale, o_ref.dtype)


def _qkv_mha_kernel(q_ref, kv_ref, o_ref, *, num_heads, scale):
    """Cross attention: separate query and packed [k|v] inputs."""
    E = o_ref.shape[-1]
    D = E // num_heads
    for h in range(num_heads):
        q = q_ref[0, :, h * D:(h + 1) * D]
        k = kv_ref[0, :, h * D:(h + 1) * D]
        v = kv_ref[0, :, E + h * D:E + (h + 1) * D]
        o_ref[0, :, h * D:(h + 1) * D] = _head_attention(q, k, v, scale, o_ref.dtype)


def packed_mha(qkv, num_heads):
    """qkv:(Nb, S, 3E) packed [q|k|v] -> (Nb, S, E) bf16 multi-head attention."""
    Nb, S, E3 = qkv.shape
    E = E3 // 3
    D = E // num_heads
    # TODO(synk): for long sequences switch to a flash-style online-softmax loop;
    # this model's max_length is 128 so the full (S,S) score tile fits in VMEM.
    return pl.pallas_call(
        functools.partial(_packed_mha_kernel, num_heads=num_heads,
                          scale=1.0 / (D ** 0.5)),
        out_shape=jax.ShapeDtypeStruct((Nb, S, E), BF16),
        grid=(Nb,),
        in_specs=[pl.BlockSpec((1, S, E3), lambda n: (n, 0, 0))],
        out_specs=pl.BlockSpec((1, S, E), lambda n: (n, 0, 0)),
        compiler_params=_cparams("parallel"),
    )(qkv.astype(BF16))


def qkv_mha(q, kv, num_heads):
    """q:(Nb, S, E), kv:(Nb, S, 2E) packed [k|v] -> (Nb, S, E) bf16."""
    Nb, S, E = q.shape
    D = E // num_heads
    return pl.pallas_call(
        functools.partial(_qkv_mha_kernel, num_heads=num_heads,
                          scale=1.0 / (D ** 0.5)),
        out_shape=jax.ShapeDtypeStruct((Nb, S, E), BF16),
        grid=(Nb,),
        in_specs=[pl.BlockSpec((1, S, E), lambda n: (n, 0, 0)),
                  pl.BlockSpec((1, S, 2 * E), lambda n: (n, 0, 0))],
        out_specs=pl.BlockSpec((1, S, E), lambda n: (n, 0, 0)),
        compiler_params=_cparams("parallel"),
    )(q.astype(BF16), kv.astype(BF16))


def _det_head_kernel(x_ref, w1_ref, b1_ref, g_ref, be_ref, w2_ref, b2_ref,
                     m_ref, o_ref, *, eps):
    x = x_ref[...].astype(BF16)                                          # (tm, H)
    h = jnp.dot(x, w1_ref[...], preferred_element_type=jnp.float32) + b1_ref[...]
    mu = jnp.mean(h, axis=-1, keepdims=True)
    hc = h - mu
    var = jnp.mean(hc * hc, axis=-1, keepdims=True)
    h = hc * jax.lax.rsqrt(var + eps) * g_ref[...] + be_ref[...]
    h = _gelu(h)
    # Final Linear(H, 1) as a (1,H) x (tm,H) contraction so the output stays
    # lane-dense ((1, tm) instead of an N=1 masked store).
    z = jax.lax.dot_general(w2_ref[...], h.astype(BF16),
                            (((1,), (1,)), ((), ())),
                            preferred_element_type=jnp.float32)          # (1, tm)
    prob = 1.0 / (1.0 + jnp.exp(-(z + b2_ref[...])))
    o_ref[...] = (prob * m_ref[...]).astype(o_ref.dtype)


def detection_head(hidden_flat, p, attention_mask, eps=1e-5, tm=512):
    """Fused Linear -> LayerNorm -> GELU -> Linear(H,1) -> Sigmoid -> * mask."""
    M, H = hidden_flat.shape
    B, L = attention_mask.shape
    tm = _tile(M, tm, 128)
    out = pl.pallas_call(
        functools.partial(_det_head_kernel, eps=eps),
        out_shape=jax.ShapeDtypeStruct((1, M), F32),
        grid=(M // tm,),
        in_specs=[pl.BlockSpec((tm, H), lambda i: (i, 0)),
                  pl.BlockSpec((H, H), lambda i: (0, 0)),
                  pl.BlockSpec((1, H), lambda i: (0, 0)),
                  pl.BlockSpec((1, H), lambda i: (0, 0)),
                  pl.BlockSpec((1, H), lambda i: (0, 0)),
                  pl.BlockSpec((1, H), lambda i: (0, 0)),
                  pl.BlockSpec((1, 1), lambda i: (0, 0)),
                  pl.BlockSpec((1, tm), lambda i: (0, i))],
        out_specs=pl.BlockSpec((1, tm), lambda i: (0, i)),
        compiler_params=_cparams("parallel"),
    )(hidden_flat, p['head_w1'], p['head_b1'].reshape(1, H),
      p['head_ln_g'].reshape(1, H), p['head_ln_b'].reshape(1, H),
      p['head_w2'], p['head_b2'], attention_mask.astype(F32).reshape(1, M))
    return out.reshape(B, L)


def _vocab_kernel(h_ref, e_ref, b_ref, o_ref):
    logits = jax.lax.dot_general(h_ref[0], e_ref[...], (((1,), (1,)), ((), ())),
                                 preferred_element_type=jnp.float32)     # (tl, tv)
    o_ref[0] = (logits + b_ref[...]).astype(o_ref.dtype)


def vocab_project(hidden, emb_table, b, tl=256, tv=512):
    """logits[b,l,v] = <hidden[b,l,:], emb_table[v,:]> + b[v].

    Contracts against the tied embedding table in its native (V, H) layout.  The V
    axis is outermost so each (tv,H) embedding tile is DMA'd once and reused across
    all (batch, L) steps; V uses a cdiv grid (Pallas masks the ragged edge), so no
    full-V fallback block can blow VMEM at real vocab sizes.
    """
    B, L, H = hidden.shape
    V = emb_table.shape[0]
    tl = _tile(L, tl, 8)
    tv = V if V <= tv else tv
    gv = pl.cdiv(V, tv)
    cost = pl.CostEstimate(flops=2 * B * L * V * H, transcendentals=0,
                           bytes_accessed=2 * B * L * H * gv + 2 * V * H + 4 * B * L * V)
    return pl.pallas_call(
        _vocab_kernel,
        out_shape=jax.ShapeDtypeStruct((B, L, V), F32),
        grid=(gv, B, L // tl),
        in_specs=[pl.BlockSpec((1, tl, H), lambda vi, bi, li: (bi, li, 0)),
                  pl.BlockSpec((tv, H), lambda vi, bi, li: (vi, 0)),
                  pl.BlockSpec((1, tv), lambda vi, bi, li: (0, vi))],
        out_specs=pl.BlockSpec((1, tl, tv), lambda vi, bi, li: (bi, li, vi)),
        compiler_params=_cparams("parallel", "parallel", "parallel"),
        cost_estimate=cost,
    )(hidden.astype(BF16), emb_table.astype(BF16), b.astype(F32).reshape(1, V))


# --------------------------- composite modules -----------------------------

def cross_attention(word_emb, summary_emb, p, num_heads=8):
    """nn.MultiheadAttention(batch_first=False) fed (B, L, H): axis0 is the sequence
    (= B) and axis1 the batch (= L) — the PyTorch quirk reproduced faithfully."""
    B, L, H = word_emb.shape
    q = linear(summary_emb.reshape(B * L, H), p['wq'], p['bq'], out_dtype=BF16)
    kv = linear(word_emb.reshape(B * L, H), p['wkv'], p['bkv'], out_dtype=BF16)
    q = jnp.transpose(q.reshape(B, L, H), (1, 0, 2))          # (L, B, H) bf16
    kv = jnp.transpose(kv.reshape(B, L, 2 * H), (1, 0, 2))    # (L, B, 2H) bf16
    ctx = qkv_mha(q, kv, num_heads)                           # (L, B, H) bf16
    ctx = jnp.transpose(ctx, (1, 0, 2)).reshape(B * L, H)
    return linear(ctx, p['wo'], p['bo'], out_dtype=BF16).reshape(B, L, H)


def bert_block(x32, x16, p, num_heads=8):
    """Standard BERT encoder layer (post-LN).  x32 (f32 residual stream) and x16
    (bf16 matmul input) carry the same values; both (B, L, H)."""
    B, L, H = x32.shape
    xf32 = x32.reshape(B * L, H)
    xf16 = x16.reshape(B * L, H)
    qkv = linear(xf16, p['wqkv'], p['bqkv'], out_dtype=BF16)        # fused Q|K|V
    ctx = packed_mha(qkv.reshape(B, L, 3 * H), num_heads)           # (B, L, H) bf16
    x1_32, x1_16 = linear_add_ln(ctx.reshape(B * L, H), p['wo'], p['bo'],
                                 xf32, p['ln1_g'], p['ln1_b'], eps=1e-12)
    inter = linear(x1_16, p['wi'], p['bi'], act="gelu", out_dtype=BF16)
    x2_32, x2_16 = linear_add_ln(inter, p['wo2'], p['bo2'],
                                 x1_32, p['ln2_g'], p['ln2_b'], eps=1e-12)
    return x2_32.reshape(B, L, H), x2_16.reshape(B, L, H)


def detection_forward(p, input_ids, attention_mask, summary_ids, summary_mask):
    E = p['emb']                                            # (V, H) f32
    B, L = input_ids.shape
    H = E.shape[1]
    word_emb = jnp.take(E, input_ids, axis=0)               # (B, L, H)
    summary_emb = jnp.take(E, summary_ids, axis=0) * summary_mask[..., None]
    # TODO(synk): nn.Dropout(0.1) in train mode not reproduced (treated as identity).
    summary_ctx = cross_attention(word_emb, summary_emb, p['cross_attn'], num_heads=8)
    fused = jnp.concatenate([word_emb.astype(BF16), summary_ctx], axis=-1)
    input_embeds = linear(fused.reshape(B * L, 2 * H), p['fusion_w'], p['fusion_b'])
    x32 = input_embeds.reshape(B, L, H) + p['pos_emb'][:L][None, :, :]
    x16 = x32.astype(BF16)
    for blk in p['blocks']:
        x32, x16 = bert_block(x32, x16, blk, num_heads=8)
    det = detection_head(x32.reshape(B * L, H), p, attention_mask)
    return x32, det


def correction_forward(p, input_ids, detect_hidden):
    # TODO(synk): ChineseBERT (pinyin-id construction, pretrained weights, external
    # config files) has no in-script equivalent; replaced by a synthetic embedding +
    # 2-layer transformer encoder producing last_hidden_state.
    E = p['emb']                                            # (V, H)
    B, L = input_ids.shape
    H = E.shape[1]
    x32 = jnp.take(E, input_ids, axis=0) + p['pos_emb'][:L][None, :, :]
    x16 = x32.astype(BF16)
    for blk in p['blocks']:
        x32, x16 = bert_block(x32, x16, blk, num_heads=8)
    hidden = (x32 + detect_hidden).astype(BF16)             # (B, L, H)
    # TODO(synk): cal_error_weight needs sighan_all.json + the BERT tokenizer vocab;
    # with no confusion statistics it degenerates to an all-ones weight, so both the
    # weight multiply and the duplicated dense_layer + argmax that fed it are elided.
    return vocab_project(hidden, E, p['out_b'])


def mdcspell_forward(params, input_ids, attention_mask, summary_ids, summary_mask):
    hidden, detection_outputs = detection_forward(
        params['det'], input_ids, attention_mask, summary_ids, summary_mask)
    correction_outputs = correction_forward(params['cor'], input_ids, hidden)
    return correction_outputs, detection_outputs


# ----------------------------- parameter setup -----------------------------

def _w(key, shape, scale=0.02, dtype=F32):
    return (scale * jax.random.normal(key, shape, dtype=F32)).astype(dtype)


def make_block_params(key, H, I):
    ks = jax.random.split(key, 4)
    return dict(
        wqkv=_w(ks[0], (H, 3 * H), dtype=BF16), bqkv=jnp.zeros((3 * H,), F32),
        wo=_w(ks[1], (H, H), dtype=BF16), bo=jnp.zeros((H,), F32),
        ln1_g=jnp.ones((H,), F32), ln1_b=jnp.zeros((H,), F32),
        wi=_w(ks[2], (H, I), dtype=BF16), bi=jnp.zeros((I,), F32),
        wo2=_w(ks[3], (I, H), dtype=BF16), bo2=jnp.zeros((H,), F32),
        ln2_g=jnp.ones((H,), F32), ln2_b=jnp.zeros((H,), F32),
    )


def make_params(key, V, H, I, L_max):
    kd, kc = jax.random.split(key)
    kds = jax.random.split(kd, 9)
    det = dict(
        emb=_w(kds[0], (V, H)),
        pos_emb=_w(kds[1], (L_max, H)),
        cross_attn=dict(
            wq=_w(kds[2], (H, H), dtype=BF16), bq=jnp.zeros((H,), F32),
            wkv=_w(kds[3], (H, 2 * H), dtype=BF16), bkv=jnp.zeros((2 * H,), F32),
            wo=_w(kds[4], (H, H), dtype=BF16), bo=jnp.zeros((H,), F32),
        ),
        fusion_w=_w(kds[5], (2 * H, H), dtype=BF16), fusion_b=jnp.zeros((H,), F32),
        blocks=[make_block_params(k, H, I) for k in jax.random.split(kds[6], 2)],
        head_w1=_w(kds[7], (H, H), dtype=BF16), head_b1=jnp.zeros((H,), F32),
        head_ln_g=jnp.ones((H,), F32), head_ln_b=jnp.zeros((H,), F32),
        head_w2=_w(kds[8], (1, H), dtype=BF16), head_b2=jnp.zeros((1, 1), F32),
    )
    kcs = jax.random.split(kc, 3)
    cor = dict(
        emb=_w(kcs[0], (V, H)),
        pos_emb=_w(kcs[1], (L_max, H)),
        blocks=[make_block_params(k, H, I) for k in jax.random.split(kcs[2], 2)],
        out_b=jnp.zeros((V,), F32),
    )
    return dict(det=det, cor=cor)


# ----------------------------------- main -----------------------------------

if __name__ == "__main__":
    B, L, H, V, I, L_max = 2, 8, 32, 64, 64, 16
    key = jax.random.PRNGKey(0)
    kp, k1, k2 = jax.random.split(key, 3)
    params = make_params(kp, V, H, I, L_max)

    input_ids = jax.random.randint(k1, (B, L), 0, V, dtype=jnp.int32)
    summary_ids = jax.random.randint(k2, (B, L), 0, V, dtype=jnp.int32)
    attention_mask = jnp.ones((B, L), F32)
    summary_mask = jnp.ones((B, L), F32)

    correction_outputs, detection_outputs = mdcspell_forward(
        params, input_ids, attention_mask, summary_ids, summary_mask)
    jax.block_until_ready((correction_outputs, detection_outputs))

    assert correction_outputs.shape == (B, L, V)
    assert detection_outputs.shape == (B, L)
    print("KERNEL_OK")
</pallas_src>

<mosaic_0001>
module attributes {stable_mosaic.version = 11 : i64} {
  func.func @_linear_bf16_kernel(%arg0: i32, %arg1: i32, %arg2: i32, %arg3: memref<16x32xbf16, #tpu.memory_space<vmem>>, %arg4: memref<32x32xbf16, #tpu.memory_space<vmem>>, %arg5: memref<1x32xf32, #tpu.memory_space<vmem>>, %arg6: memref<16x32xbf16, #tpu.memory_space<vmem>>, %arg7: memref<16x32xf32, #tpu.memory_space<vmem>>) attributes {dimension_semantics = [#tpu.dimension_semantics<parallel>, #tpu.dimension_semantics<parallel>, #tpu.dimension_semantics<arbitrary>], iteration_bounds = array<i64: 1, 1, 1>, scalar_prefetch = 0 : i64, scratch_operands = 1 : i64, tpu.core_type = #tpu.core_type<tc>, window_params = [{transform_indices = @transform_0, window_bounds = array<i64: 16, 32>}, {transform_indices = @transform_1, window_bounds = array<i64: 32, 32>}, {transform_indices = @transform_2, window_bounds = array<i64: 1, 32>}, {transform_indices = @transform_3, window_bounds = array<i64: 16, 32>}]} {
    %c0_i32 = arith.constant 0 : i32
    %0 = arith.cmpi eq, %arg2, %c0_i32 : i32
    %1 = arith.extui %0 : i1 to i32
    %c0_i32_0 = arith.constant 0 : i32
    %2 = arith.cmpi ne, %1, %c0_i32_0 : i32
    scf.if %2 {
      %cst_10 = arith.constant 0.000000e+00 : f32
      %12 = vector.broadcast %cst_10 : f32 to vector<16x32xf32>
      %c0_11 = arith.constant 0 : index
      %c0_12 = arith.constant 0 : index
      %13 = vector.load %arg7[%c0_11, %c0_12] : memref<16x32xf32, #tpu.memory_space<vmem>>, vector<16x32xf32>
      tpu.vector_store %arg7[%c0_11, %c0_12], %12 {strides = array<i32>} : memref<16x32xf32, #tpu.memory_space<vmem>>, vector<16x32xf32>,
    } else {
    }
    %c0 = arith.constant 0 : index
    %c0_1 = arith.constant 0 : index
    %3 = vector.load %arg7[%c0, %c0_1] : memref<16x32xf32, #tpu.memory_space<vmem>>, vector<16x32xf32>
    %c0_2 = arith.constant 0 : index
    %c0_3 = arith.constant 0 : index
    %4 = vector.load %arg3[%c0_2, %c0_3] : memref<16x32xbf16, #tpu.memory_space<vmem>>, vector<16x32xbf16>
    %c0_4 = arith.constant 0 : index
    %c0_5 = arith.constant 0 : index
    %5 = vector.load %arg4[%c0_4, %c0_5] : memref<32x32xbf16, #tpu.memory_space<vmem>>, vector<32x32xbf16>
    %cst = arith.constant dense<0.000000e+00> : vector<16x32xf32>
    %6 = tpu.matmul %4, %5, %cst {dimension_numbers = #tpu.dot_dimension_numbers<[1], [0], [0], [1], [0, 0, 1, 1], [], []>} : vector<16x32xbf16>, vector<32x32xbf16>, vector<16x32xf32> -> vector<16x32xf32>
    %7 = arith.addf %3, %6 : vector<16x32xf32>
    %c0_6 = arith.constant 0 : index
    %c0_7 = arith.constant 0 : index
    %8 = vector.load %arg7[%c0_6, %c0_7] : memref<16x32xf32, #tpu.memory_space<vmem>>, vector<16x32xf32>
    tpu.vector_store %arg7[%c0_6, %c0_7], %7 {strides = array<i32>} : memref<16x32xf32, #tpu.memory_space<vmem>>, vector<16x32xf32>,
    %c0_i32_8 = arith.constant 0 : i32
    %9 = arith.cmpi eq, %arg2, %c0_i32_8 : i32
    %10 = arith.extui %9 : i1 to i32
    %c0_i32_9 = arith.constant 0 : i32
    %11 = arith.cmpi ne, %10, %c0_i32_9 : i32
    scf.if %11 {
      %c0_10 = arith.constant 0 : index
      %c0_11 = arith.constant 0 : index
      %12 = vector.load %arg7[%c0_10, %c0_11] : memref<16x32xf32, #tpu.memory_space<vmem>>, vector<16x32xf32>
      %c0_12 = arith.constant 0 : index
      %c0_13 = arith.constant 0 : index
      %13 = vector.load %arg5[%c0_12, %c0_13] : memref<1x32xf32, #tpu.memory_space<vmem>>, vector<1x32xf32>
      %14 = vector.broadcast %13 : vector<1x32xf32> to vector<16x32xf32>
      %15 = arith.addf %12, %14 : vector<16x32xf32>
      %16 = arith.truncf %15 : vector<16x32xf32> to vector<16x32xbf16>
      %c0_14 = arith.constant 0 : index
      %c0_15 = arith.constant 0 : index
      %17 = vector.load %arg6[%c0_14, %c0_15] : memref<16x32xbf16, #tpu.memory_space<vmem>>, vector<16x32xbf16>
      tpu.vector_store %arg6[%c0_14, %c0_15], %16 {strides = array<i32>} : memref<16x32xbf16, #tpu.memory_space<vmem>>, vector<16x32xbf16>,
    } else {
    }
    return
  }
  func.func @transform_0(%arg0: i32, %arg1: i32, %arg2: i32) -> (i32, i32) {
    %c0_i32 = arith.constant 0 : i32
    return %arg0, %arg2 : i32, i32
  }
  func.func @transform_1(%arg0: i32, %arg1: i32, %arg2: i32) -> (i32, i32) {
    %c0_i32 = arith.constant 0 : i32
    return %arg2, %arg1 : i32, i32
  }
  func.func @transform_2(%arg0: i32, %arg1: i32, %arg2: i32) -> (i32, i32) {
    %c0_i32 = arith.constant 0 : i32
    %c0_i32_0 = arith.constant 0 : i32
    return %c0_i32, %arg1 : i32, i32
  }
  func.func @transform_3(%arg0: i32, %arg1: i32, %arg2: i32) -> (i32, i32) {
    %c0_i32 = arith.constant 0 : i32
    return %arg0, %arg1 : i32, i32
  }
}

</mosaic_0001>

<bundles_post_ra>
// kernel: tpu_custom_call.1
= control target key start
LH: loop header
LB: loop body
LE: loop exit
PB: predicated region body
PF: predicated region fallthrough
CT: control target
= control target key end

     0   :  { %8 = vsyncpa [#allocation4], 0  ;;  %s350_s0 = inlined_call_operand.hbm [shape: bf16[16,32], index: 0, kind: input, shape index: {}]   ;;  %s351_s1 = inlined_call_operand.hbm [shape: bf16[32,32], index: 1, kind: input, shape index: {}]   ;;  %s352_s2 = inlined_call_operand.vmem [shape: f32[1,32], index: 2, kind: input, shape index: {}]   ;;  %s353_s3 = inlined_call_operand.hbm [shape: bf16[16,32], index: 3, kind: output, shape index: {}]  }
   0x1   :  { %9 = vsyncpa [#allocation7], 0 }
   0x2   :  { %10 = vsyncpa [#allocation5], 0  ;;  %s270_s12 = smov [#allocation3]   ;;  %s198_s16 = scalar_lea.hbm %s350_s0, 128 }
   0x3   :  { %s16_s13 = sshll.u32 %s270_s12, 4  ;;  %p199_p0 = scmp.ne.s32.totalorder %s350_s0, %s198_s16  ;;  %s17_s13 = int_to_ptr.vmem [resolvable:$true] %s16_s13 }
   0x4   :  { %p202_p1 = scmp.lt.u32.totalorder %s198_s16, %s350_s0 }
   0x6   :  { %p204_p2 = pnand %p202_p1, %p199_p0 }
   0x8   :  { %207 = shalt.err (!%p204_p2)
}
   0x9   :  { %s208_s21 = scalar_lea.vmem %s17_s13, 128  ;;  %p213_p4 = scmp.lt.s32.totalorder %s17_s13, %s17_s13 }
   0xa   :  { %p209_p3 = scmp.ne.s32.totalorder %s17_s13, %s208_s21  ;;  %p214_p5 = scmp.lt.s32.totalorder %s208_s21, %s208_s21 }
   0xc   :  { %p215_p6 = por %p214_p5, %p213_p4 }
   0xe   :  { %p216_p7 = pnand %p215_p6, %p209_p3 }
  0x10   :  { %219 = shalt.err (!%p216_p7)
}
  0x11   :  { %s271_s22 = smov 64   ;;  %s272_s23 = smov 4  }
  0x12   :  { %22 = dma.hbm_to_vmem [thread:$0]  %s350_s0, 128, %s17_s13, [#allocation4], %s271_s22, %s271_s22, %s272_s23  }
  0x13   :  { %s273_s26 = smov [#allocation6]   ;;  %s220_s30 = scalar_lea.hbm %s351_s1, 256 }
  0x14   :  { %s28_s27 = sshll.u32 %s273_s26, 4  ;;  %p221_p8 = scmp.ne.s32.totalorder %s351_s1, %s220_s30  ;;  %s29_s27 = int_to_ptr.vmem [resolvable:$true] %s28_s27 }
  0x15   :  { %p224_p9 = scmp.lt.u32.totalorder %s220_s30, %s351_s1 }
  0x17   :  { %p226_p10 = pnand %p224_p9, %p221_p8 }
  0x19   :  { %229 = shalt.err (!%p226_p10)
}
  0x1a   :  { %s230_s8 = scalar_lea.vmem %s29_s27, 256  ;;  %p235_p12 = scmp.lt.s32.totalorder %s29_s27, %s29_s27 }
  0x1b   :  { %p231_p11 = scmp.ne.s32.totalorder %s29_s27, %s230_s8  ;;  %p236_p13 = scmp.lt.s32.totalorder %s230_s8, %s230_s8 }
  0x1d   :  { %p237_p0 = por %p236_p13, %p235_p12 }
  0x1f   :  { %p238_p1 = pnand %p237_p0, %p231_p11 }
  0x21   :  { %241 = shalt.err (!%p238_p1)
}
  0x22   :  { %34 = dma.hbm_to_vmem [thread:$0]  %s351_s1, 256, %s29_s27, [#allocation7], %s271_s22, %s271_s22, %s272_s23  }
  0x23   :  { %264 = dma.done.wait [#allocation4], 128  }
  0x24   :  { %265 = vsyncadd [#allocation4], 4294967168 }
  0x25   :  { %266 = dma.done.wait [#allocation7], 256  }
  0x26   :  { %267 = vsyncadd [#allocation7], 4294967040  ;;  %vm48_vm0 = vcmask 261120   ;;  %v274_v0 = vmov 0.0   ;;  %vm275_vm1 = vmmov 0   ;;  %v195_v1 = vld [vmem:[#allocation6] sm:$0xff]  }
  0x27   :  { %180 = vmatprep.subr.bf16.mxu0 %v274_v0  ;;  %184 = vmatprep.mubr.msk.bf16.mxu0 %vm275_vm1, %v274_v0  ;;  %49 = vst.msk [vmem:[#allocation2] sm:$0xff] %vm48_vm0, %v274_v0  ;;  %50 = vst.msk [vmem:[#allocation2 + $0x8] sm:$0xff] %vm48_vm0, %v274_v0  ;;  %v196_v2 = vld [vmem:[#allocation6 + $0x8] sm:$0xff]   ;;  %v197_v3 = vld [vmem:[#allocation3] sm:$0xff]   ;;  %vm147_vm2 = vcmask 257024   ;;  %s276_s11 = smov [#allocation8]  }
  0x28   :  { %181 = vmatpush3.bf16.msra.mxu0 %v195_v1  ;;  %v172_v12 = vld [vmem:[%s352_s2] ss:$0 sm:$0xff]  ;;  %s155_s12 = sshll.u32 %s276_s11, 4  ;;  %s156_s12 = int_to_ptr.vmem [resolvable:$true] %s155_s12 }
  0x29   :  { %182 = vmatprep.subr.bf16.mxu0 %v274_v0  ;;  %s242_s13 = scalar_lea.vmem %s156_s12, 128  ;;  %p247_p3 = scmp.lt.s32.totalorder %s156_s12, %s156_s12 }
  0x2a   :  { %p243_p2 = scmp.ne.s32.totalorder %s156_s12, %s242_s13  ;;  %p248_p4 = scmp.lt.s32.totalorder %s242_s13, %s242_s13 }
  0x2c   :  { %183 = vmatpush3.bf16.msra.mxu0 %v196_v2  ;;  %p249_p5 = por %p248_p4, %p247_p3 }
  0x2e   :  { %v51_v4 = vld [vmem:[#allocation2] sm:$0xff]  ;;  %v52_v6 = vld [vmem:[#allocation2 + $0x8] sm:$0xff]  ;;  %p250_p6 = pnand %p249_p5, %p243_p2 }
  0x2f   :  { %185 = vmatmul.mubr.msk.bf16.vlgmr.msra.gmra.mrb[0].mxu0 %vm48_vm0, %v197_v3 }
 0x102   :  { %v114_v5 = vpop.f32.mrb[0].mxu0 }
 0x103   :  { %v121_v7 = vadd.f32 %v114_v5, %v51_v4  ;;  %v186_v8 = vpop.f32.mrb[1].mxu0 }
 0x104   :  { %v117_v9 = vpop.f32.mrb[2].mxu0 }
 0x105   :  { %123 = vst.msk [vmem:[#allocation2] sm:$0xff] %vm48_vm0, %v121_v7  ;;  %v122_v10 = vadd.f32 %v117_v9, %v52_v6  ;;  %v187_v11 = vpop.f32.mrb[3].mxu0 }
 0x107   :  { %124 = vst.msk [vmem:[#allocation2 + $0x8] sm:$0xff] %vm48_vm0, %v122_v10 }
 0x10c   :  { %v128_v13 = vld [vmem:[#allocation2] sm:$0xff] }
 0x10d   :  { %v137_v14 = vadd.f32 %v172_v12, %v128_v13 }
 0x10e   :  { %v129_v15 = vld [vmem:[#allocation2 + $0x8] sm:$0xff] }
 0x10f   :  { %v138_v16 = vadd.f32 %v172_v12, %v129_v15  ;;  %v175_v17 = vpack.c.bf16 %v137_v14, %v137_v14 }
 0x111   :  { %v176_v18 = vpack.c.bf16 %v138_v16, %v138_v16  ;;  %148 = vst.msk [vmem:[#allocation8] sm:$0xf] %vm147_vm2, %v175_v17 }
 0x113   :  { %149 = vst.msk [vmem:[#allocation8 + $0x4] sm:$0xf] %vm147_vm2, %v176_v18 }
 0x114   :  { %253 = shalt.err (!%p250_p6)
}
 0x115   :  { %s254_s15 = scalar_lea.hbm %s353_s3, 128 }
 0x116   :  { %p255_p7 = scmp.ne.s32.totalorder %s353_s3, %s254_s15  ;;  %p258_p8 = scmp.lt.u32.totalorder %s254_s15, %s353_s3 }
 0x118   :  { %p260_p9 = pnand %p258_p8, %p255_p7 }
 0x11a   :  { %263 = shalt.err (!%p260_p9)
}
 0x11b   :  { %161 = dma.vmem_to_hbm [thread:$0]  %s156_s12, 128, %s353_s3, [#allocation5], %s271_s22, %s271_s22, %s272_s23  }
 0x11c   :  { %268 = dma.done.wait [#allocation5], 128  }
 0x11d   :  { %269 = vsyncadd [#allocation5], 4294967168 }
 0x11e   :  { %165 = vsyncpa [#allocation4], 1 }
 0x11f   :  { %166 = vsyncpa [#allocation7], 1 }
 0x120   :  { %167 = vsyncpa [#allocation5], 1 }

</bundles_post_ra>
